<compile_context>
chip_gen: v5e
topology: v5e:2x2
jax: 0.10.0
libtpu: 0.0.40
codegen_flags: <defaults>
</compile_context>

<pallas_src>
import functools

import jax
import jax.numpy as jnp
from jax import lax
from jax.experimental import pallas as pl
from jax.experimental.pallas import tpu as pltpu

NEG_INF = -0.7 * float(jnp.finfo(jnp.float32).max)   # finite mask value (avoids 0/0 NaNs)
_VMEM_LIMIT = 32 * 1024 * 1024                       # explicit scoped-VMEM budget (safe on v5e/v6e/v7x)
_RMS_EPS = 1.1920929e-07                             # torch.finfo(float32).eps (nn.RMSNorm default)


# ----------------------------------------------------------------------------
# helpers
# ----------------------------------------------------------------------------

def _round_up(x, m):
    return ((x + m - 1) // m) * m


def _pad_axis(x, axis, new_len):
    if x.shape[axis] == new_len:
        return x
    pad = [(0, 0)] * x.ndim
    pad[axis] = (0, new_len - x.shape[axis])
    return jnp.pad(x, pad)


def _block(dim, target):
    """Return (block_size, padded_extent).  Full dim when small (always a legal block),
    otherwise an aligned tile (targets are multiples of (8, 128))."""
    if dim <= target:
        return dim, dim
    return target, _round_up(dim, target)


# ----------------------------------------------------------------------------
# Pallas kernels
# ----------------------------------------------------------------------------

def _matmul_kernel(x_ref, w_ref, o_ref, acc_ref):
    @pl.when(pl.program_id(2) == 0)
    def _():
        acc_ref[...] = jnp.zeros_like(acc_ref)

    acc_ref[...] += jnp.dot(x_ref[...], w_ref[...], preferred_element_type=jnp.float32)

    @pl.when(pl.program_id(2) == pl.num_programs(2) - 1)
    def _():
        o_ref[...] = acc_ref[...].astype(o_ref.dtype)


def _rmsnorm_matmul_kernel(x_ref, g_ref, w_ref, o_ref, *, eps):
    """RMSNorm over the full feature dim fused with the following projection."""
    x = x_ref[...].astype(jnp.float32)
    ms = jnp.mean(x * x, axis=-1, keepdims=True)
    xn = (x * lax.rsqrt(ms + eps) * g_ref[...].astype(jnp.float32)).astype(x_ref.dtype)
    o_ref[...] = jnp.dot(xn, w_ref[...],
                         preferred_element_type=jnp.float32).astype(o_ref.dtype)


def _flash_attn_kernel(q_ref, k_ref, v_ref, mask_ref, o_ref,
                       m_sc, l_sc, acc_sc, *, scale, offset, tkv):
    j = pl.program_id(2)
    nq = q_ref.shape[1]

    @pl.when(j == 0)
    def _():
        m_sc[...] = jnp.full(m_sc.shape, NEG_INF, jnp.float32)
        l_sc[...] = jnp.zeros(l_sc.shape, jnp.float32)
        acc_sc[...] = jnp.zeros(acc_sc.shape, jnp.float32)

    # skip kv blocks that are entirely in the causal future of every query row
    @pl.when(j * tkv <= offset + nq - 1)
    def _():
        q = q_ref[...]                       # (G, nq, d) native dtype -> MXU, f32 accumulate
        k = k_ref[...]                       # (G, tkv, d)
        v = v_ref[...]

        s = jnp.einsum('gqd,gkd->gqk', q, k,
                       preferred_element_type=jnp.float32) * scale     # (G, nq, tkv) f32

        row = lax.broadcasted_iota(jnp.int32, s.shape, 1)
        col = lax.broadcasted_iota(jnp.int32, s.shape, 2) + j * tkv
        keep = col <= row + offset                                     # kv-cache-aware causal
        key_ok = mask_ref[...] > 0                                     # (1, 1, tkv) key padding
        keep = jnp.logical_and(keep, key_ok)
        s = jnp.where(keep, s, NEG_INF)

        m_prev = m_sc[...]
        m_new = jnp.maximum(m_prev, jnp.max(s, axis=-1, keepdims=True))
        alpha = jnp.exp(m_prev - m_new)
        p = jnp.exp(s - m_new)
        l_sc[...] = alpha * l_sc[...] + jnp.sum(p, axis=-1, keepdims=True)
        acc_sc[...] = alpha * acc_sc[...] + jnp.einsum(
            'gqk,gkd->gqd', p.astype(v.dtype), v, preferred_element_type=jnp.float32)
        m_sc[...] = m_new

    @pl.when(j == pl.num_programs(2) - 1)
    def _():
        inv_l = pl.reciprocal(l_sc[...], approx=True)                  # EUP, off the VALU
        o_ref[...] = (acc_sc[...] * inv_l).astype(o_ref.dtype)


# ----------------------------------------------------------------------------
# Pallas wrappers
# ----------------------------------------------------------------------------

def linear(x, w, *, tm=256, tn=256, tk=512):
    """x: (..., K) @ w: (K, N) — tiled, pipelined matmul with f32 accumulator scratch."""
    orig = x.shape
    K = orig[-1]
    N = w.shape[-1]
    x2 = x.reshape(-1, K)
    M = x2.shape[0]

    bm, Mp = _block(M, tm)
    bn, Np = _block(N, tn)
    bk, Kp = _block(K, tk)
    x2 = _pad_axis(_pad_axis(x2, 0, Mp), 1, Kp)
    wp = _pad_axis(_pad_axis(w, 0, Kp), 1, Np)

    out = pl.pallas_call(
        _matmul_kernel,
        out_shape=jax.ShapeDtypeStruct((Mp, Np), x.dtype),
        grid=(Mp // bm, Np // bn, Kp // bk),
        in_specs=[pl.BlockSpec((bm, bk), lambda i, j, k: (i, k)),
                  pl.BlockSpec((bk, bn), lambda i, j, k: (k, j))],
        out_specs=pl.BlockSpec((bm, bn), lambda i, j, k: (i, j)),
        scratch_shapes=[pltpu.VMEM((bm, bn), jnp.float32)],
        compiler_params=pltpu.CompilerParams(
            dimension_semantics=("parallel", "parallel", "arbitrary"),
            vmem_limit_bytes=_VMEM_LIMIT),
    )(x2, wp)
    return out[:M, :N].reshape(orig[:-1] + (N,))


def rmsnorm_linear(x, g, w, *, eps=_RMS_EPS, tm=256, tn=256):
    """RMSNorm(x) @ w fused (K = model dim stays untiled so the row reduction is exact)."""
    orig = x.shape
    K = orig[-1]
    N = w.shape[-1]
    x2 = x.reshape(-1, K)
    M = x2.shape[0]

    bm, Mp = _block(M, tm)
    bn, Np = _block(N, tn)
    x2 = _pad_axis(x2, 0, Mp)
    wp = _pad_axis(w, 1, Np)

    out = pl.pallas_call(
        functools.partial(_rmsnorm_matmul_kernel, eps=eps),
        out_shape=jax.ShapeDtypeStruct((Mp, Np), x.dtype),
        grid=(Mp // bm, Np // bn),
        in_specs=[pl.BlockSpec((bm, K), lambda i, j: (i, 0)),
                  pl.BlockSpec((1, K), lambda i, j: (0, 0)),
                  pl.BlockSpec((K, bn), lambda i, j: (0, j))],
        out_specs=pl.BlockSpec((bm, bn), lambda i, j: (i, j)),
        compiler_params=pltpu.CompilerParams(
            dimension_semantics=("parallel", "parallel"),
            vmem_limit_bytes=_VMEM_LIMIT),
    )(x2, g.reshape(1, K), wp)
    return out[:M, :N].reshape(orig[:-1] + (N,))


def attend(q, k, v, mask=None, *, scale, kv_block_target=256):
    """Causal flash attention with KV-cache offset and optional key padding mask."""
    b, h, nq, d = q.shape
    nk = k.shape[-2]
    offset = nk - nq

    if mask is None:
        mask = jnp.ones((b, nk), dtype=jnp.int32)
    else:
        mask = mask.astype(jnp.int32)

    tkv, nk_p = _block(nk, kv_block_target)
    qf = q.reshape(b * h, nq, d)
    kf = _pad_axis(k.reshape(b * h, nk, d), 1, nk_p)
    vf = _pad_axis(v.reshape(b * h, nk, d), 1, nk_p)
    maskf = _pad_axis(mask, 1, nk_p).reshape(b, 1, nk_p)

    # group G heads per grid step (amortizes per-step overhead; keeps kv tiles under ~8 MiB)
    itemsize = jnp.dtype(q.dtype).itemsize
    G = h
    while G > 1 and 4 * G * tkv * d * itemsize > 8 * 1024 * 1024:
        G -= 1
        while h % G:
            G -= 1
    hg = h // G

    kernel = functools.partial(_flash_attn_kernel, scale=scale, offset=offset, tkv=tkv)
    out = pl.pallas_call(
        kernel,
        out_shape=jax.ShapeDtypeStruct((b * h, nq, d), q.dtype),
        grid=(b, hg, nk_p // tkv),
        in_specs=[
            pl.BlockSpec((G, nq, d), lambda bi, hi, ji: (bi * hg + hi, 0, 0)),
            pl.BlockSpec((G, tkv, d), lambda bi, hi, ji: (bi * hg + hi, ji, 0)),
            pl.BlockSpec((G, tkv, d), lambda bi, hi, ji: (bi * hg + hi, ji, 0)),
            pl.BlockSpec((1, 1, tkv), lambda bi, hi, ji: (bi, 0, ji)),
        ],
        out_specs=pl.BlockSpec((G, nq, d), lambda bi, hi, ji: (bi * hg + hi, 0, 0)),
        scratch_shapes=[
            pltpu.VMEM((G, nq, 1), jnp.float32),
            pltpu.VMEM((G, nq, 1), jnp.float32),
            pltpu.VMEM((G, nq, d), jnp.float32),
        ],
        compiler_params=pltpu.CompilerParams(
            dimension_semantics=("parallel", "parallel", "arbitrary"),
            vmem_limit_bytes=_VMEM_LIMIT),
    )(qf, kf, vf, maskf)
    return out.reshape(b, h, nq, d)


# ----------------------------------------------------------------------------
# Rotary embedding helpers (rotary_embedding_torch semantics, interleaved pairs)
# ----------------------------------------------------------------------------

def rotate_half(x):
    x = x.reshape(x.shape[:-1] + (-1, 2))
    x1, x2 = x[..., 0], x[..., 1]
    return jnp.stack((-x2, x1), axis=-1).reshape(x.shape[:-2] + (-1,))


def apply_rotary(freqs, t):
    return t * jnp.cos(freqs) + rotate_half(t) * jnp.sin(freqs)


# ----------------------------------------------------------------------------
# Attention forward (plain-JAX glue around the Pallas kernels)
# ----------------------------------------------------------------------------

def attention_forward(params, x, mask=None, cached_kv=None, return_intermediates=False,
                      value_residual=None, rotary_pos_emb=None,
                      *, heads, dim_head, eps=_RMS_EPS):
    b, n, _ = x.shape
    h, d = heads, dim_head
    scale = d ** -0.5

    has_vr = params['vr_mix'] is not None
    assert has_vr == (value_residual is not None)   # matches the reference xor-assert

    # fold the value-residual-mixing projection into the qkv matmul (single fused kernel)
    w = params['to_qkv'] if not has_vr else jnp.concatenate(
        (params['to_qkv'], params['vr_mix']), axis=1)
    proj = rmsnorm_linear(x, params['norm'], w, eps=eps)       # (b, n, 3*h*d [+ h])

    qkv = proj[..., :3 * h * d].reshape(b, n, 3, h, d)
    qkv = jnp.transpose(qkv, (2, 0, 3, 1, 4))                  # (3, b, h, n, d)
    q, k, v = qkv[0], qkv[1], qkv[2]
    orig_v = v

    if has_vr:
        mix = jax.nn.sigmoid(proj[..., 3 * h * d:])            # (b, n, h)
        mix = jnp.transpose(mix, (0, 2, 1))[..., None]          # (b, h, n, 1)
        v = v + mix * (value_residual - v)                      # torch lerp

    if cached_kv is not None:
        ck, cv = cached_kv[0], cached_kv[1]
        k = jnp.concatenate((ck, k), axis=-2)
        v = jnp.concatenate((cv, v), axis=-2)

    new_cached_kv = jnp.stack((k, v)) if return_intermediates else None

    if rotary_pos_emb is not None:
        q = apply_rotary(rotary_pos_emb[..., -n:, :], q)        # freqs_seq_dim=-2 behavior
        k = apply_rotary(rotary_pos_emb, k)

    out = attend(q, k, v, mask, scale=scale)                    # (b, h, n, d)
    out = jnp.transpose(out, (0, 2, 1, 3)).reshape(b, n, h * d) # merge heads
    out = linear(out, params['to_out'])

    if not return_intermediates:
        return out
    return out, (new_cached_kv, orig_v)


# ----------------------------------------------------------------------------
# Deterministic parameter init (shapes from the module __init__)
# ----------------------------------------------------------------------------

def init_attention_params(key, dim, heads, dim_head, accept_value_residual=False):
    dim_inner = heads * dim_head
    k1, k2, k3 = jax.random.split(key, 3)

    def nrm(k, shape, fan_in):
        return jax.random.normal(k, shape, jnp.float32) * (fan_in ** -0.5)

    return {
        'norm': jnp.ones((dim,), jnp.float32),                       # nn.RMSNorm weight
        'to_qkv': nrm(k1, (dim, 3 * dim_inner), dim),                # bias=False
        'to_out': nrm(k2, (dim_inner, dim), dim_inner),              # bias=False
        'vr_mix': nrm(k3, (dim, heads), dim) if accept_value_residual else None,
    }


# ----------------------------------------------------------------------------
# Demo
# ----------------------------------------------------------------------------

if __name__ == "__main__":
    batch, seq, cache_len = 2, 8, 8
    dim, heads, dim_head = 128, 4, 64        # module defaults are dim_head=64

    key = jax.random.PRNGKey(0)
    kp1, kp2, kx, kc1, kc2, kvr = jax.random.split(key, 6)

    params_plain = init_attention_params(kp1, dim, heads, dim_head, accept_value_residual=False)
    params_vr = init_attention_params(kp2, dim, heads, dim_head, accept_value_residual=True)

    x = jax.random.normal(kx, (batch, seq, dim), jnp.float32)
    cached_k = jax.random.normal(kc1, (batch, heads, cache_len, dim_head), jnp.float32)
    cached_v = jax.random.normal(kc2, (batch, heads, cache_len, dim_head), jnp.float32)
    cached_kv = jnp.stack((cached_k, cached_v))
    value_residual = jax.random.normal(kvr, (batch, heads, seq, dim_head), jnp.float32)

    total = cache_len + seq
    mask = jnp.ones((batch, total), dtype=bool).at[1, :2].set(False)   # key padding mask

    inv_freqs = 1.0 / (10000.0 ** (jnp.arange(0, dim_head, 2, dtype=jnp.float32) / dim_head))
    pos = jnp.arange(total, dtype=jnp.float32)
    rotary_pos_emb = jnp.repeat(pos[:, None] * inv_freqs[None, :], 2, axis=-1)  # (total, d)

    fwd_plain = jax.jit(functools.partial(attention_forward, heads=heads, dim_head=dim_head))
    fwd_full = jax.jit(functools.partial(attention_forward, heads=heads, dim_head=dim_head,
                                         return_intermediates=True))

    out_plain = fwd_plain(params_plain, x)
    out_full, (new_kv, orig_v) = fwd_full(params_vr, x, mask, cached_kv,
                                          value_residual=value_residual,
                                          rotary_pos_emb=rotary_pos_emb)
    jax.block_until_ready((out_plain, out_full, new_kv, orig_v))

    assert out_plain.shape == (batch, seq, dim)
    assert out_full.shape == (batch, seq, dim)
    assert new_kv.shape == (2, batch, heads, total, dim_head)
    assert orig_v.shape == (batch, heads, seq, dim_head)
    for t in (out_plain, out_full, new_kv, orig_v):
        assert bool(jnp.all(jnp.isfinite(t)))
    print("KERNEL_OK")
</pallas_src>

<mosaic_0001>
module attributes {stable_mosaic.version = 11 : i64} {
  func.func @_rmsnorm_matmul_kernel(%arg0: i32, %arg1: i32, %arg2: memref<16x128xf32, #tpu.memory_space<vmem>>, %arg3: memref<1x128xf32, #tpu.memory_space<vmem>>, %arg4: memref<128x256xf32, #tpu.memory_space<vmem>>, %arg5: memref<16x256xf32, #tpu.memory_space<vmem>>) attributes {dimension_semantics = [#tpu.dimension_semantics<parallel>, #tpu.dimension_semantics<parallel>], iteration_bounds = array<i64: 1, 3>, scalar_prefetch = 0 : i64, scratch_operands = 0 : i64, tpu.core_type = #tpu.core_type<tc>, window_params = [{transform_indices = @transform_0, window_bounds = array<i64: 16, 128>}, {pipeline_mode = #tpu.pipeline_mode<synchronous>, transform_indices = @transform_1, window_bounds = array<i64: 1, 128>}, {transform_indices = @transform_2, window_bounds = array<i64: 128, 256>}, {transform_indices = @transform_3, window_bounds = array<i64: 16, 256>}]} {
    %c0 = arith.constant 0 : index
    %c0_0 = arith.constant 0 : index
    %0 = vector.load %arg2[%c0, %c0_0] : memref<16x128xf32, #tpu.memory_space<vmem>>, vector<16x128xf32>
    %1 = arith.mulf %0, %0 : vector<16x128xf32>
    %cst = arith.constant dense<0.000000e+00> : vector<16xf32>
    %2 = vector.multi_reduction <add>, %1, %cst [1] : vector<16x128xf32> to vector<16xf32>
    %3 = vector.shape_cast %2 : vector<16xf32> to vector<16x1xf32>
    %cst_1 = arith.constant 1.280000e+02 : f32
    %4 = vector.broadcast %cst_1 : f32 to vector<16x1xf32>
    %5 = arith.divf %3, %4 : vector<16x1xf32>
    %cst_2 = arith.constant 1.1920929E-7 : f32
    %6 = vector.broadcast %cst_2 : f32 to vector<16x1xf32>
    %7 = arith.addf %5, %6 : vector<16x1xf32>
    %8 = math.rsqrt %7 : vector<16x1xf32>
    %9 = vector.broadcast %8 : vector<16x1xf32> to vector<16x128xf32>
    %10 = arith.mulf %0, %9 : vector<16x128xf32>
    %c0_3 = arith.constant 0 : index
    %c0_4 = arith.constant 0 : index
    %11 = vector.load %arg3[%c0_3, %c0_4] : memref<1x128xf32, #tpu.memory_space<vmem>>, vector<1x128xf32>
    %12 = vector.broadcast %11 : vector<1x128xf32> to vector<16x128xf32>
    %13 = arith.mulf %10, %12 : vector<16x128xf32>
    %c0_5 = arith.constant 0 : index
    %c0_6 = arith.constant 0 : index
    %14 = vector.load %arg4[%c0_5, %c0_6] : memref<128x256xf32, #tpu.memory_space<vmem>>, vector<128x256xf32>
    %cst_7 = arith.constant dense<0.000000e+00> : vector<16x256xf32>
    %15 = tpu.matmul %13, %14, %cst_7 {dimension_numbers = #tpu.dot_dimension_numbers<[1], [0], [0], [1], [0, 0, 1, 1], [], []>} : vector<16x128xf32>, vector<128x256xf32>, vector<16x256xf32> -> vector<16x256xf32>
    %c0_8 = arith.constant 0 : index
    %c0_9 = arith.constant 0 : index
    %16 = vector.load %arg5[%c0_8, %c0_9] : memref<16x256xf32, #tpu.memory_space<vmem>>, vector<16x256xf32>
    tpu.vector_store %arg5[%c0_8, %c0_9], %15 {strides = array<i32>} : memref<16x256xf32, #tpu.memory_space<vmem>>, vector<16x256xf32>,
    return
  }
  func.func @transform_0(%arg0: i32, %arg1: i32) -> (i32, i32) {
    %c0_i32 = arith.constant 0 : i32
    %c0_i32_0 = arith.constant 0 : i32
    return %arg0, %c0_i32 : i32, i32
  }
  func.func @transform_1(%arg0: i32, %arg1: i32) -> (i32, i32) {
    %c0_i32 = arith.constant 0 : i32
    %c0_i32_0 = arith.constant 0 : i32
    %c0_i32_1 = arith.constant 0 : i32
    return %c0_i32, %c0_i32_0 : i32, i32
  }
  func.func @transform_2(%arg0: i32, %arg1: i32) -> (i32, i32) {
    %c0_i32 = arith.constant 0 : i32
    %c0_i32_0 = arith.constant 0 : i32
    return %c0_i32, %arg1 : i32, i32
  }
  func.func @transform_3(%arg0: i32, %arg1: i32) -> (i32, i32) {
    %c0_i32 = arith.constant 0 : i32
    return %arg0, %arg1 : i32, i32
  }
}

module attributes {stable_mosaic.version = 11 : i64} {
  func.func @_matmul_kernel(%arg0: i32, %arg1: i32, %arg2: i32, %arg3: memref<16x256xf32, #tpu.memory_space<vmem>>, %arg4: memref<256x128xf32, #tpu.memory_space<vmem>>, %arg5: memref<16x128xf32, #tpu.memory_space<vmem>>, %arg6: memref<16x128xf32, #tpu.memory_space<vmem>>) attributes {dimension_semantics = [#tpu.dimension_semantics<parallel>, #tpu.dimension_semantics<parallel>, #tpu.dimension_semantics<arbitrary>], iteration_bounds = array<i64: 1, 1, 1>, scalar_prefetch = 0 : i64, scratch_operands = 1 : i64, tpu.core_type = #tpu.core_type<tc>, window_params = [{transform_indices = @transform_0, window_bounds = array<i64: 16, 256>}, {transform_indices = @transform_1, window_bounds = array<i64: 256, 128>}, {transform_indices = @transform_2, window_bounds = array<i64: 16, 128>}]} {
    %c0_i32 = arith.constant 0 : i32
    %0 = arith.cmpi eq, %arg2, %c0_i32 : i32
    %1 = arith.extui %0 : i1 to i32
    %c0_i32_0 = arith.constant 0 : i32
    %2 = arith.cmpi ne, %1, %c0_i32_0 : i32
    scf.if %2 {
      %cst_10 = arith.constant 0.000000e+00 : f32
      %12 = vector.broadcast %cst_10 : f32 to vector<16x128xf32>
      %c0_11 = arith.constant 0 : index
      %c0_12 = arith.constant 0 : index
      %13 = vector.load %arg6[%c0_11, %c0_12] : memref<16x128xf32, #tpu.memory_space<vmem>>, vector<16x128xf32>
      tpu.vector_store %arg6[%c0_11, %c0_12], %12 {strides = array<i32>} : memref<16x128xf32, #tpu.memory_space<vmem>>, vector<16x128xf32>,
    } else {
    }
    %c0 = arith.constant 0 : index
    %c0_1 = arith.constant 0 : index
    %3 = vector.load %arg6[%c0, %c0_1] : memref<16x128xf32, #tpu.memory_space<vmem>>, vector<16x128xf32>
    %c0_2 = arith.constant 0 : index
    %c0_3 = arith.constant 0 : index
    %4 = vector.load %arg3[%c0_2, %c0_3] : memref<16x256xf32, #tpu.memory_space<vmem>>, vector<16x256xf32>
    %c0_4 = arith.constant 0 : index
    %c0_5 = arith.constant 0 : index
    %5 = vector.load %arg4[%c0_4, %c0_5] : memref<256x128xf32, #tpu.memory_space<vmem>>, vector<256x128xf32>
    %cst = arith.constant dense<0.000000e+00> : vector<16x128xf32>
    %6 = tpu.matmul %4, %5, %cst {dimension_numbers = #tpu.dot_dimension_numbers<[1], [0], [0], [1], [0, 0, 1, 1], [], []>} : vector<16x256xf32>, vector<256x128xf32>, vector<16x128xf32> -> vector<16x128xf32>
    %7 = arith.addf %3, %6 : vector<16x128xf32>
    %c0_6 = arith.constant 0 : index
    %c0_7 = arith.constant 0 : index
    %8 = vector.load %arg6[%c0_6, %c0_7] : memref<16x128xf32, #tpu.memory_space<vmem>>, vector<16x128xf32>
    tpu.vector_store %arg6[%c0_6, %c0_7], %7 {strides = array<i32>} : memref<16x128xf32, #tpu.memory_space<vmem>>, vector<16x128xf32>,
    %c0_i32_8 = arith.constant 0 : i32
    %9 = arith.cmpi eq, %arg2, %c0_i32_8 : i32
    %10 = arith.extui %9 : i1 to i32
    %c0_i32_9 = arith.constant 0 : i32
    %11 = arith.cmpi ne, %10, %c0_i32_9 : i32
    scf.if %11 {
      %c0_10 = arith.constant 0 : index
      %c0_11 = arith.constant 0 : index
      %12 = vector.load %arg6[%c0_10, %c0_11] : memref<16x128xf32, #tpu.memory_space<vmem>>, vector<16x128xf32>
      %c0_12 = arith.constant 0 : index
      %c0_13 = arith.constant 0 : index
      %13 = vector.load %arg5[%c0_12, %c0_13] : memref<16x128xf32, #tpu.memory_space<vmem>>, vector<16x128xf32>
      tpu.vector_store %arg5[%c0_12, %c0_13], %12 {strides = array<i32>} : memref<16x128xf32, #tpu.memory_space<vmem>>, vector<16x128xf32>,
    } else {
    }
    return
  }
  func.func @transform_0(%arg0: i32, %arg1: i32, %arg2: i32) -> (i32, i32) {
    %c0_i32 = arith.constant 0 : i32
    return %arg0, %arg2 : i32, i32
  }
  func.func @transform_1(%arg0: i32, %arg1: i32, %arg2: i32) -> (i32, i32) {
    %c0_i32 = arith.constant 0 : i32
    return %arg2, %arg1 : i32, i32
  }
  func.func @transform_2(%arg0: i32, %arg1: i32, %arg2: i32) -> (i32, i32) {
    %c0_i32 = arith.constant 0 : i32
    return %arg0, %arg1 : i32, i32
  }
}

module attributes {stable_mosaic.version = 11 : i64} {
  func.func @_flash_attn_kernel(%arg0: i32, %arg1: i32, %arg2: i32, %arg3: memref<4x8x64xf32, #tpu.memory_space<vmem>>, %arg4: memref<4x8x64xf32, #tpu.memory_space<vmem>>, %arg5: memref<4x8x64xf32, #tpu.memory_space<vmem>>, %arg6: memref<1x1x8xi32, #tpu.memory_space<vmem>>, %arg7: memref<4x8x64xf32, #tpu.memory_space<vmem>>, %arg8: memref<4x8x1xf32, #tpu.memory_space<vmem>>, %arg9: memref<4x8x1xf32, #tpu.memory_space<vmem>>, %arg10: memref<4x8x64xf32, #tpu.memory_space<vmem>>) attributes {dimension_semantics = [#tpu.dimension_semantics<parallel>, #tpu.dimension_semantics<parallel>, #tpu.dimension_semantics<arbitrary>], iteration_bounds = array<i64: 2, 1, 1>, scalar_prefetch = 0 : i64, scratch_operands = 3 : i64, tpu.core_type = #tpu.core_type<tc>, window_params = [{transform_indices = @transform_0, window_bounds = array<i64: 4, 8, 64>}, {transform_indices = @transform_1, window_bounds = array<i64: 4, 8, 64>}, {transform_indices = @transform_2, window_bounds = array<i64: 4, 8, 64>}, {transform_indices = @transform_3, window_bounds = array<i64: 1, 1, 8>}, {transform_indices = @transform_4, window_bounds = array<i64: 4, 8, 64>}]} {
    %c0_i32 = arith.constant 0 : i32
    %0 = arith.cmpi eq, %arg2, %c0_i32 : i32
    %1 = arith.extui %0 : i1 to i32
    %c0_i32_0 = arith.constant 0 : i32
    %2 = arith.cmpi ne, %1, %c0_i32_0 : i32
    scf.if %2 {
      %cst = arith.constant -2.38197633E+38 : f32
      %10 = vector.broadcast %cst : f32 to vector<4x8x1xf32>
      %c0 = arith.constant 0 : index
      %c0_4 = arith.constant 0 : index
      %c0_5 = arith.constant 0 : index
      %11 = vector.load %arg8[%c0, %c0_4, %c0_5] : memref<4x8x1xf32, #tpu.memory_space<vmem>>, vector<4x8x1xf32>
      tpu.vector_store %arg8[%c0, %c0_4, %c0_5], %10 {strides = array<i32>} : memref<4x8x1xf32, #tpu.memory_space<vmem>>, vector<4x8x1xf32>,
      %cst_6 = arith.constant 0.000000e+00 : f32
      %12 = vector.broadcast %cst_6 : f32 to vector<4x8x1xf32>
      %c0_7 = arith.constant 0 : index
      %c0_8 = arith.constant 0 : index
      %c0_9 = arith.constant 0 : index
      %13 = vector.load %arg9[%c0_7, %c0_8, %c0_9] : memref<4x8x1xf32, #tpu.memory_space<vmem>>, vector<4x8x1xf32>
      tpu.vector_store %arg9[%c0_7, %c0_8, %c0_9], %12 {strides = array<i32>} : memref<4x8x1xf32, #tpu.memory_space<vmem>>, vector<4x8x1xf32>,
      %cst_10 = arith.constant 0.000000e+00 : f32
      %14 = vector.broadcast %cst_10 : f32 to vector<4x8x64xf32>
      %c0_11 = arith.constant 0 : index
      %c0_12 = arith.constant 0 : index
      %c0_13 = arith.constant 0 : index
      %15 = vector.load %arg10[%c0_11, %c0_12, %c0_13] : memref<4x8x64xf32, #tpu.memory_space<vmem>>, vector<4x8x64xf32>
      tpu.vector_store %arg10[%c0_11, %c0_12, %c0_13], %14 {strides = array<i32>} : memref<4x8x64xf32, #tpu.memory_space<vmem>>, vector<4x8x64xf32>,
    } else {
    }
    %c8_i32 = arith.constant 8 : i32
    %3 = arith.muli %arg2, %c8_i32 : i32
    %c7_i32 = arith.constant 7 : i32
    %4 = arith.cmpi sle, %3, %c7_i32 : i32
    %5 = arith.extui %4 : i1 to i32
    %c0_i32_1 = arith.constant 0 : i32
    %6 = arith.cmpi ne, %5, %c0_i32_1 : i32
    scf.if %6 {
      %c0 = arith.constant 0 : index
      %c0_4 = arith.constant 0 : index
      %c0_5 = arith.constant 0 : index
      %10 = vector.load %arg3[%c0, %c0_4, %c0_5] : memref<4x8x64xf32, #tpu.memory_space<vmem>>, vector<4x8x64xf32>
      %c0_6 = arith.constant 0 : index
      %c0_7 = arith.constant 0 : index
      %c0_8 = arith.constant 0 : index
      %11 = vector.load %arg4[%c0_6, %c0_7, %c0_8] : memref<4x8x64xf32, #tpu.memory_space<vmem>>, vector<4x8x64xf32>
      %c0_9 = arith.constant 0 : index
      %c0_10 = arith.constant 0 : index
      %c0_11 = arith.constant 0 : index
      %12 = vector.load %arg5[%c0_9, %c0_10, %c0_11] : memref<4x8x64xf32, #tpu.memory_space<vmem>>, vector<4x8x64xf32>
      "tpu.trace_start"() <{level = 10 : i32, message = "gqd,gkd->gqk"}> : () -> ()
      %cst = arith.constant dense<0.000000e+00> : vector<4x8x8xf32>
      %13 = tpu.matmul %10, %11, %cst {dimension_numbers = #tpu.dot_dimension_numbers<[2], [2], [1], [1], [0, 0, 0, 1, 1, 1], [0], [0]>} : vector<4x8x64xf32>, vector<4x8x64xf32>, vector<4x8x8xf32> -> vector<4x8x8xf32>
      "tpu.trace_stop"() : () -> ()
      %cst_12 = arith.constant 1.250000e-01 : f32
      %14 = vector.broadcast %cst_12 : f32 to vector<4x8x8xf32>
      %15 = arith.mulf %13, %14 : vector<4x8x8xf32>
      %16 = tpu.iota {dimensions = array<i32: 1>} : vector<4x8x8xi32>
      %17 = tpu.iota {dimensions = array<i32: 2>} : vector<4x8x8xi32>
      %c8_i32_13 = arith.constant 8 : i32
      %18 = arith.muli %arg2, %c8_i32_13 : i32
      %19 = vector.broadcast %18 : i32 to vector<4x8x8xi32>
      %20 = arith.addi %17, %19 : vector<4x8x8xi32>
      %c0_i32_14 = arith.constant 0 : i32
      %21 = vector.broadcast %c0_i32_14 : i32 to vector<4x8x8xi32>
      %22 = arith.addi %16, %21 : vector<4x8x8xi32>
      %23 = arith.cmpi sle, %20, %22 : vector<4x8x8xi32>
      %c0_15 = arith.constant 0 : index
      %c0_16 = arith.constant 0 : index
      %c0_17 = arith.constant 0 : index
      %24 = vector.load %arg6[%c0_15, %c0_16, %c0_17] : memref<1x1x8xi32, #tpu.memory_space<vmem>>, vector<1x1x8xi32>
      %c0_i32_18 = arith.constant 0 : i32
      %25 = vector.broadcast %c0_i32_18 : i32 to vector<1x1x8xi32>
      %26 = arith.cmpi sgt, %24, %25 : vector<1x1x8xi32>
      %27 = vector.broadcast %26 : vector<1x1x8xi1> to vector<4x8x8xi1>
      %28 = arith.andi %23, %27 : vector<4x8x8xi1>
      %cst_19 = arith.constant -2.38197633E+38 : f32
      %29 = vector.broadcast %cst_19 : f32 to vector<4x8x8xf32>
      %30 = arith.select %28, %15, %29 : vector<4x8x8xi1>, vector<4x8x8xf32>
      %c0_20 = arith.constant 0 : index
      %c0_21 = arith.constant 0 : index
      %c0_22 = arith.constant 0 : index
      %31 = vector.load %arg8[%c0_20, %c0_21, %c0_22] : memref<4x8x1xf32, #tpu.memory_space<vmem>>, vector<4x8x1xf32>
      %cst_23 = arith.constant dense<0xFF800000> : vector<4x8xf32>
      %32 = vector.multi_reduction <maximumf>, %30, %cst_23 [2] : vector<4x8x8xf32> to vector<4x8xf32>
      %33 = vector.shape_cast %32 : vector<4x8xf32> to vector<4x8x1xf32>
      %34 = arith.maximumf %31, %33 : vector<4x8x1xf32>
      %35 = arith.subf %31, %34 : vector<4x8x1xf32>
      %36 = math.exp %35 : vector<4x8x1xf32>
      %37 = vector.broadcast %34 : vector<4x8x1xf32> to vector<4x8x8xf32>
      %38 = arith.subf %30, %37 : vector<4x8x8xf32>
      %39 = math.exp %38 : vector<4x8x8xf32>
      %c0_24 = arith.constant 0 : index
      %c0_25 = arith.constant 0 : index
      %c0_26 = arith.constant 0 : index
      %40 = vector.load %arg9[%c0_24, %c0_25, %c0_26] : memref<4x8x1xf32, #tpu.memory_space<vmem>>, vector<4x8x1xf32>
      %41 = arith.mulf %36, %40 : vector<4x8x1xf32>
      %cst_27 = arith.constant dense<0.000000e+00> : vector<4x8xf32>
      %42 = vector.multi_reduction <add>, %39, %cst_27 [2] : vector<4x8x8xf32> to vector<4x8xf32>
      %43 = vector.shape_cast %42 : vector<4x8xf32> to vector<4x8x1xf32>
      %44 = arith.addf %41, %43 : vector<4x8x1xf32>
      %c0_28 = arith.constant 0 : index
      %c0_29 = arith.constant 0 : index
      %c0_30 = arith.constant 0 : index
      %45 = vector.load %arg9[%c0_28, %c0_29, %c0_30] : memref<4x8x1xf32, #tpu.memory_space<vmem>>, vector<4x8x1xf32>
      tpu.vector_store %arg9[%c0_28, %c0_29, %c0_30], %44 {strides = array<i32>} : memref<4x8x1xf32, #tpu.memory_space<vmem>>, vector<4x8x1xf32>,
      %c0_31 = arith.constant 0 : index
      %c0_32 = arith.constant 0 : index
      %c0_33 = arith.constant 0 : index
      %46 = vector.load %arg10[%c0_31, %c0_32, %c0_33] : memref<4x8x64xf32, #tpu.memory_space<vmem>>, vector<4x8x64xf32>
      %47 = vector.broadcast %36 : vector<4x8x1xf32> to vector<4x8x64xf32>
      %48 = arith.mulf %47, %46 : vector<4x8x64xf32>
      "tpu.trace_start"() <{level = 10 : i32, message = "gqk,gkd->gqd"}> : () -> ()
      %cst_34 = arith.constant dense<0.000000e+00> : vector<4x8x64xf32>
      %49 = tpu.matmul %39, %12, %cst_34 {dimension_numbers = #tpu.dot_dimension_numbers<[2], [1], [1], [2], [0, 0, 0, 1, 1, 2], [0], [0]>} : vector<4x8x8xf32>, vector<4x8x64xf32>, vector<4x8x64xf32> -> vector<4x8x64xf32>
      "tpu.trace_stop"() : () -> ()
      %50 = arith.addf %48, %49 : vector<4x8x64xf32>
      %c0_35 = arith.constant 0 : index
      %c0_36 = arith.constant 0 : index
      %c0_37 = arith.constant 0 : index
      %51 = vector.load %arg10[%c0_35, %c0_36, %c0_37] : memref<4x8x64xf32, #tpu.memory_space<vmem>>, vector<4x8x64xf32>
      tpu.vector_store %arg10[%c0_35, %c0_36, %c0_37], %50 {strides = array<i32>} : memref<4x8x64xf32, #tpu.memory_space<vmem>>, vector<4x8x64xf32>,
      %c0_38 = arith.constant 0 : index
      %c0_39 = arith.constant 0 : index
      %c0_40 = arith.constant 0 : index
      %52 = vector.load %arg8[%c0_38, %c0_39, %c0_40] : memref<4x8x1xf32, #tpu.memory_space<vmem>>, vector<4x8x1xf32>
      tpu.vector_store %arg8[%c0_38, %c0_39, %c0_40], %34 {strides = array<i32>} : memref<4x8x1xf32, #tpu.memory_space<vmem>>, vector<4x8x1xf32>,
    } else {
    }
    %c0_i32_2 = arith.constant 0 : i32
    %7 = arith.cmpi eq, %arg2, %c0_i32_2 : i32
    %8 = arith.extui %7 : i1 to i32
    %c0_i32_3 = arith.constant 0 : i32
    %9 = arith.cmpi ne, %8, %c0_i32_3 : i32
    scf.if %9 {
      %c0 = arith.constant 0 : index
      %c0_4 = arith.constant 0 : index
      %c0_5 = arith.constant 0 : index
      %10 = vector.load %arg9[%c0, %c0_4, %c0_5] : memref<4x8x1xf32, #tpu.memory_space<vmem>>, vector<4x8x1xf32>
      %11 = tpu.reciprocal %10 {approx = true} : vector<4x8x1xf32> -> vector<4x8x1xf32>
      %c0_6 = arith.constant 0 : index
      %c0_7 = arith.constant 0 : index
      %c0_8 = arith.constant 0 : index
      %12 = vector.load %arg10[%c0_6, %c0_7, %c0_8] : memref<4x8x64xf32, #tpu.memory_space<vmem>>, vector<4x8x64xf32>
      %13 = vector.broadcast %11 : vector<4x8x1xf32> to vector<4x8x64xf32>
      %14 = arith.mulf %12, %13 : vector<4x8x64xf32>
      %c0_9 = arith.constant 0 : index
      %c0_10 = arith.constant 0 : index
      %c0_11 = arith.constant 0 : index
      %15 = vector.load %arg7[%c0_9, %c0_10, %c0_11] : memref<4x8x64xf32, #tpu.memory_space<vmem>>, vector<4x8x64xf32>
      tpu.vector_store %arg7[%c0_9, %c0_10, %c0_11], %14 {strides = array<i32>} : memref<4x8x64xf32, #tpu.memory_space<vmem>>, vector<4x8x64xf32>,
    } else {
    }
    return
  }
  func.func @transform_0(%arg0: i32, %arg1: i32, %arg2: i32) -> (i32, i32, i32) {
    %c1_i32 = arith.constant 1 : i32
    %0 = arith.muli %arg0, %c1_i32 : i32
    %1 = arith.addi %0, %arg1 : i32
    %c0_i32 = arith.constant 0 : i32
    %c0_i32_0 = arith.constant 0 : i32
    %c0_i32_1 = arith.constant 0 : i32
    return %1, %c0_i32, %c0_i32_0 : i32, i32, i32
  }
  func.func @transform_1(%arg0: i32, %arg1: i32, %arg2: i32) -> (i32, i32, i32) {
    %c1_i32 = arith.constant 1 : i32
    %0 = arith.muli %arg0, %c1_i32 : i32
    %1 = arith.addi %0, %arg1 : i32
    %c0_i32 = arith.constant 0 : i32
    %c0_i32_0 = arith.constant 0 : i32
    return %1, %arg2, %c0_i32 : i32, i32, i32
  }
  func.func @transform_2(%arg0: i32, %arg1: i32, %arg2: i32) -> (i32, i32, i32) {
    %c1_i32 = arith.constant 1 : i32
    %0 = arith.muli %arg0, %c1_i32 : i32
    %1 = arith.addi %0, %arg1 : i32
    %c0_i32 = arith.constant 0 : i32
    %c0_i32_0 = arith.constant 0 : i32
    return %1, %arg2, %c0_i32 : i32, i32, i32
  }
  func.func @transform_3(%arg0: i32, %arg1: i32, %arg2: i32) -> (i32, i32, i32) {
    %c0_i32 = arith.constant 0 : i32
    %c0_i32_0 = arith.constant 0 : i32
    return %arg0, %c0_i32, %arg2 : i32, i32, i32
  }
  func.func @transform_4(%arg0: i32, %arg1: i32, %arg2: i32) -> (i32, i32, i32) {
    %c1_i32 = arith.constant 1 : i32
    %0 = arith.muli %arg0, %c1_i32 : i32
    %1 = arith.addi %0, %arg1 : i32
    %c0_i32 = arith.constant 0 : i32
    %c0_i32_0 = arith.constant 0 : i32
    %c0_i32_1 = arith.constant 0 : i32
    return %1, %c0_i32, %c0_i32_0 : i32, i32, i32
  }
}

</mosaic_0001>

<bundles_post_ra>
// kernel: attention_forward.5
= control target key start
LH: loop header
LB: loop body
LE: loop exit
PB: predicated region body
PF: predicated region fallthrough
CT: control target
= control target key end

     0   :  { %s321_s0 = inlined_call_operand.vmem [shape: f32[16,256], index: 0, kind: input, shape index: {}]   ;;  %s322_s1 = inlined_call_operand.vmem [shape: f32[256,128], index: 1, kind: input, shape index: {}]   ;;  %s323_s2 = inlined_call_operand.hbm [shape: f32[16,128], index: 2, kind: output, shape index: {}]  }
   0x1   :  { %v39_v0 = vld [vmem:[%s322_s1 + $0x78] sm:$0xff]  ;;  %v38_v2 = vld [vmem:[%s322_s1 + $0x70] sm:$0xff]  ;;  %v37_v4 = vld [vmem:[%s322_s1 + $0x68] sm:$0xff] }
   0x2   :  { %v55_v1 = vld [vmem:[%s322_s1 + $0xf8] sm:$0xff]  ;;  %131 = vmatpush.msra.mxu2 %v39_v0  ;;  %v54_v3 = vld [vmem:[%s322_s1 + $0xf0] sm:$0xff]  ;;  %v53_v5 = vld [vmem:[%s322_s1 + $0xe8] sm:$0xff]  ;;  %56 = vmatpush.msra.mxu0 %v39_v0 }
   0x3   :  { %147 = vmatpush.msra.mxu3 %v55_v1  ;;  %79 = vmatpush.msra.mxu1 %v55_v1  ;;  %v36_v6 = vld [vmem:[%s322_s1 + $0x60] sm:$0xff]  ;;  %v35_v8 = vld [vmem:[%s322_s1 + $0x58] sm:$0xff]  ;;  %v34_v10 = vld [vmem:[%s322_s1 + $0x50] sm:$0xff] }
   0x4   :  { %132 = vmatpush.msra.mxu2 %v38_v2  ;;  %v52_v7 = vld [vmem:[%s322_s1 + $0xe0] sm:$0xff]  ;;  %57 = vmatpush.msra.mxu0 %v38_v2  ;;  %v51_v9 = vld [vmem:[%s322_s1 + $0xd8] sm:$0xff]  ;;  %v50_v11 = vld [vmem:[%s322_s1 + $0xd0] sm:$0xff] }
   0x5   :  { %148 = vmatpush.msra.mxu3 %v54_v3  ;;  %80 = vmatpush.msra.mxu1 %v54_v3  ;;  %v33_v12 = vld [vmem:[%s322_s1 + $0x48] sm:$0xff]  ;;  %v32_v14 = vld [vmem:[%s322_s1 + $0x40] sm:$0xff] }
   0x6   :  { %133 = vmatpush.msra.mxu2 %v37_v4  ;;  %58 = vmatpush.msra.mxu0 %v37_v4  ;;  %v49_v13 = vld [vmem:[%s322_s1 + $0xc8] sm:$0xff]  ;;  %v48_v15 = vld [vmem:[%s322_s1 + $0xc0] sm:$0xff] }
   0x7   :  { %149 = vmatpush.msra.mxu3 %v53_v5  ;;  %81 = vmatpush.msra.mxu1 %v53_v5 }
   0x8   :  { %134 = vmatpush.msra.mxu2 %v36_v6  ;;  %59 = vmatpush.msra.mxu0 %v36_v6 }
   0x9   :  { %150 = vmatpush.msra.mxu3 %v52_v7  ;;  %82 = vmatpush.msra.mxu1 %v52_v7 }
   0xa   :  { %135 = vmatpush.msra.mxu2 %v35_v8  ;;  %60 = vmatpush.msra.mxu0 %v35_v8 }
   0xb   :  { %151 = vmatpush.msra.mxu3 %v51_v9  ;;  %83 = vmatpush.msra.mxu1 %v51_v9 }
   0xc   :  { %136 = vmatpush.msra.mxu2 %v34_v10  ;;  %61 = vmatpush.msra.mxu0 %v34_v10 }
   0xd   :  { %152 = vmatpush.msra.mxu3 %v50_v11  ;;  %84 = vmatpush.msra.mxu1 %v50_v11 }
   0xe   :  { %7 = vsyncpa [#allocation4], 0  ;;  %137 = vmatpush.msra.mxu2 %v33_v12  ;;  %v31_v16 = vld [vmem:[%s322_s1 + $0x38] sm:$0xff]  ;;  %62 = vmatpush.msra.mxu0 %v33_v12  ;;  %v30_v18 = vld [vmem:[%s322_s1 + $0x30] sm:$0xff]  ;;  %s192_s24 = smov [#allocation3]   ;;  %s119_s28 = sshll.u32 %s323_s2, 4  ;;  %s120_s28 = int_to_ptr.hbm [resolvable:$true] %s119_s28 }
   0xf   :  { %153 = vmatpush.msra.mxu3 %v49_v13  ;;  %v47_v17 = vld [vmem:[%s322_s1 + $0xb8] sm:$0xff]  ;;  %85 = vmatpush.msra.mxu1 %v49_v13  ;;  %v46_v19 = vld [vmem:[%s322_s1 + $0xb0] sm:$0xff]  ;;  %v29_v20 = vld [vmem:[%s322_s1 + $0x28] sm:$0xff]  ;;  %s117_s25 = sshll.u32 %s192_s24, 4  ;;  %s194_s29 = smov 8   ;;  %s118_s25 = int_to_ptr.vmem [resolvable:$true] %s117_s25 }
  0x10   :  { %138 = vmatpush.msra.mxu2 %v32_v14  ;;  %63 = vmatpush.msra.mxu0 %v32_v14  ;;  %v45_v21 = vld [vmem:[%s322_s1 + $0xa8] sm:$0xff]  ;;  %v28_v22 = vld [vmem:[%s322_s1 + $0x20] sm:$0xff]  ;;  %v27_v24 = vld [vmem:[%s322_s1 + $0x18] sm:$0xff] }
  0x11   :  { %154 = vmatpush.msra.mxu3 %v48_v15  ;;  %86 = vmatpush.msra.mxu1 %v48_v15  ;;  %v44_v23 = vld [vmem:[%s322_s1 + $0xa0] sm:$0xff]  ;;  %v43_v25 = vld [vmem:[%s322_s1 + $0x98] sm:$0xff]  ;;  %v26_v26 = vld [vmem:[%s322_s1 + $0x10] sm:$0xff] }
  0x12   :  { %139 = vmatpush.msra.mxu2 %v31_v16  ;;  %64 = vmatpush.msra.mxu0 %v31_v16  ;;  %v42_v27 = vld [vmem:[%s322_s1 + $0x90] sm:$0xff]  ;;  %v25_v28 = vld [vmem:[%s322_s1 + $0x8] sm:$0xff]  ;;  %v24_v30 = vld [vmem:[%s322_s1] sm:$0xff] }
  0x13   :  { %155 = vmatpush.msra.mxu3 %v47_v17  ;;  %87 = vmatpush.msra.mxu1 %v47_v17  ;;  %v41_v29 = vld [vmem:[%s322_s1 + $0x88] sm:$0xff]  ;;  %v40_v31 = vld [vmem:[%s322_s1 + $0x80] sm:$0xff]  ;;  %v22_v32 = vld [vmem:[%s321_s0 + $0x10] sm:$0xff] }
  0x14   :  { %140 = vmatpush.msra.mxu2 %v30_v18  ;;  %65 = vmatpush.msra.mxu0 %v30_v18  ;;  %v23_v33 = vld [vmem:[%s321_s0 + $0x18] sm:$0xff]  ;;  %v20_v34 = vld [vmem:[%s321_s0] sm:$0xff]  ;;  %v21_v35 = vld [vmem:[%s321_s0 + $0x8] sm:$0xff]  ;;  %s193_s0 = smov 128  }
  0x15   :  { %156 = vmatpush.msra.mxu3 %v46_v19  ;;  %88 = vmatpush.msra.mxu1 %v46_v19 }
  0x16   :  { %141 = vmatpush.msra.mxu2 %v29_v20  ;;  %66 = vmatpush.msra.mxu0 %v29_v20 }
  0x17   :  { %157 = vmatpush.msra.mxu3 %v45_v21  ;;  %89 = vmatpush.msra.mxu1 %v45_v21 }
  0x18   :  { %142 = vmatpush.msra.mxu2 %v28_v22  ;;  %67 = vmatpush.msra.mxu0 %v28_v22 }
  0x19   :  { %158 = vmatpush.msra.mxu3 %v44_v23  ;;  %90 = vmatpush.msra.mxu1 %v44_v23 }
  0x1a   :  { %143 = vmatpush.msra.mxu2 %v27_v24  ;;  %68 = vmatpush.msra.mxu0 %v27_v24 }
  0x1b   :  { %159 = vmatpush.msra.mxu3 %v43_v25  ;;  %91 = vmatpush.msra.mxu1 %v43_v25 }
  0x1c   :  { %144 = vmatpush.msra.mxu2 %v26_v26  ;;  %69 = vmatpush.msra.mxu0 %v26_v26 }
  0x1d   :  { %160 = vmatpush.msra.mxu3 %v42_v27  ;;  %92 = vmatpush.msra.mxu1 %v42_v27 }
  0x1e   :  { %145 = vmatpush.msra.mxu2 %v25_v28  ;;  %70 = vmatpush.msra.mxu0 %v25_v28 }
  0x1f   :  { %161 = vmatpush.msra.mxu3 %v41_v29  ;;  %93 = vmatpush.msra.mxu1 %v41_v29 }
  0x20   :  { %146 = vmatpush.msra.mxu2 %v24_v30  ;;  %71 = vmatpush.msra.mxu0 %v24_v30 }
  0x21   :  { %162 = vmatpush.msra.mxu3 %v40_v31  ;;  %75 = vmatmul.f32.vlgmr.msra.gmra.mxu2 %v22_v32 }
  0x22   :  { %98 = vmatmul.f32.vlgmr.msra.gmra.mxu3 %v23_v33  ;;  %94 = vmatpush.msra.mxu1 %v40_v31 }
  0x23   :  { %72 = vmatmul.f32.vlgmr.msra.gmra.mxu0 %v20_v34  ;;  %95 = vmatmul.f32.vlgmr.msra.gmra.mxu1 %v21_v35 }
  0xa0   :  { %v73_v36 = vpop.f32.mrf.mxu0  ;;  %v96_v37 = vpop.f32.mrf.mxu1 }
  0xa1   :  { %v97_v38 = vadd.f32 %v96_v37, %v73_v36 }
  0xa3   :  { %111 = vst [vmem:[#allocation3] sm:$0xff] %v97_v38 }
  0xa4   :  { %v76_v39 = vpop.f32.mrf.mxu2 }
  0xa5   :  { %v99_v40 = vpop.f32.mrf.mxu3 }
  0xa6   :  { %v100_v41 = vadd.f32 %v99_v40, %v76_v39 }
  0xa8   :  { %112 = vst [vmem:[#allocation3 + $0x8] sm:$0xff] %v100_v41 }
  0xa9   :  { %125 = dma.vmem_to_hbm [thread:$0]  %s118_s25, 256, %s120_s28, [#allocation4], %s193_s0, %s193_s0, %s194_s29  }
  0xaa   :  { %190 = dma.done.wait [#allocation4], 256  }
  0xab   :  { %191 = vsyncadd [#allocation4], 4294967040 }
  0xac   :  { %130 = vsyncpa [#allocation4], 1 }

// kernel: attention_forward.3
= control target key start
LH: loop header
LB: loop body
LE: loop exit
PB: predicated region body
PF: predicated region fallthrough
CT: control target
= control target key end

     0   :  { %8 = vsyncpa [#allocation3], 0  ;;  %s931_s0 = inlined_call_operand.hbm [shape: f32[16,128], index: 0, kind: input, shape index: {}]   ;;  %s932_s1 = inlined_call_operand.vmem [shape: f32[1,128], index: 1, kind: input, shape index: {}]   ;;  %s933_s2 = inlined_call_operand.hbm [shape: f32[128,768], index: 2, kind: input, shape index: {}]   ;;  %s934_s3 = inlined_call_operand.vmem [shape: f32[16,768], index: 3, kind: output, shape index: {}]  }
   0x1   :  { %9 = vsyncpa [#allocation5], 0 }
   0x2   :  { %11 = vsyncpa [#allocation5 + $0x1], 0  ;;  %s755_s12 = smov 0   ;;  %s757_s13 = smov 0  }
   0x3   :  { %s759_s14 = smov 0   ;;  %s761_s15 = smov 0  }
   0x4   :  { %s763_s16 = smov 0   ;;  %s765_s17 = smov 0  }
   0x5 LB: > { %s482_s18 = sadd.s32 4294967295, %s726_s17   ;;  %p96_p0 = scmp.ne.s32.totalorder %s710_s13, %s706_s12  ;;  %s726_s17 = sphi %s765_s17, %s17_s17   ;;  %s722_s16 = sphi %s763_s16, %s945_s16   ;;  %s718_s15 = sphi %s761_s15, %s944_s15   ;;  %s714_s14 = sphi %s759_s14, %s943_s14   ;;  %s710_s13 = sphi %s757_s13, %s942_s13   ;;  %s706_s12 = sphi %s755_s12, %s941_s12  }
   0x6   : > { %p785_p1 = scmp.eq.s32.totalorder %s482_s18, 0  ;;  %p789_p2 = scmp.eq.s32.totalorder %s482_s18, 2 }
   0x7   : > { %p484_p3 = scmp.ge.s32.totalorder %s726_s17, 1  ;;  %p135_p4 = scmp.lt.s32.totalorder %s726_s17, 4 }
   0x8   : > { %p797_p5 = por %p785_p1, %p96_p0  ;;  %s149_s25 = sshll.u32 %s931_s0, 4  ;;  %s150_s25 = int_to_ptr.hbm [resolvable:$true] %s149_s25 }
   0x9   : > { %p801_p6 = pnand %p484_p3, %p135_p4  ;;  %s728_s26 = smov [#allocation2]  }
   0xa   : > { %s151_s27 = sshll.u32 %s728_s26, 4  ;;  %s729_s28 = smov 128   ;;  %s152_s27 = int_to_ptr.vmem [resolvable:$true] %s151_s27 }
   0xb   : > { %p539_p7 = pneg %p801_p6  ;;  %s730_s29 = smov 8  }
   0xc   : > { %s26_s30 = sadd.s32 1, %s722_s16  ;;  %s83_s4 = sadd.s32 1, %s714_s14 }
   0xd   : > { %p540_p8 = pnand %p539_p7, %p785_p1  ;;  %p27_p9 = scmp.ge.s32.totalorder %s26_s30, 3 }
   0xe   : > { %p90_p10 = scmp.ne.s32.totalorder %s714_s14, %s710_s13  ;;  %p91_p11 = scmp.eq.s32.totalorder %s726_s17, 0 }
   0xf   : > { %542 = dma.hbm_to_vmem [thread:$0]  (!%p540_p8), %s150_s25, 256, %s152_s27, [#allocation3], %s729_s28, %s729_s28, %s730_s29  }
  0x10   : > { %p548_p12 = scmp.lt.s32.totalorder %s726_s17, 3  ;;  %s947_s30 = smov (%p27_p9, %s26_s30), 0 }
  0x11   : > { %p820_p13 = por %p91_p11, %p90_p10  ;;  %p826_p0 = por %p789_p2, %p90_p10 }
  0x12   : > { %s80_s7 = ssub.s32 %s722_s16, %s947_s30  ;;  %s168_s8 = sand.u32 1, %s714_s14  }
  0x13   : > { %p81_p3 = scmp.eq.s32.totalorder %s80_s7, 0  ;;  %s487_s9 = sshll.u32 %s168_s8, 8 }
  0x14   : > { %s499_s10 = sshll.u32 %s722_s16, 4  ;;  %s172_s25 = scalar_lea.vmem [#allocation4], %s487_s9 }
  0x15   : > { %s835_s11 = scalar_select %p81_p3, %s714_s14, %s83_s4  }
  0x16   : > { %s177_s23 = scalar_lea.hbm %s933_s2, %s499_s10  ;;  %s180_s26 = sshll.u32 %s172_s25, 4  ;;  %s181_s26 = int_to_ptr.vmem [resolvable:$true] %s180_s26 }
  0x17   : > { %s178_s24 = sshll.u32 %s177_s23, 4  ;;  %p544_p2 = pnand %p548_p12, %p820_p13  ;;  %s179_s24 = int_to_ptr.hbm [resolvable:$true] %s178_s24 }
  0x18   : > { %s169_s20 = scalar_lea.sflag [#allocation5], %s168_s8  ;;  %s731_s27 = smov 768  }
  0x19   : > { %s732_s28 = smov 256   ;;  %s733_s29 = smov 16  }
  0x1a   : > { %546 = dma.hbm_to_vmem [thread:$0]  (!%p544_p2), %s179_s24, 4096, %s181_s26, %s169_s20, %s731_s27, %s732_s28, %s733_s29  }
  0x1b   : > { %192 = sbr.rel (%p801_p6) target bundleno = 326 (0x146), region = 32 }
  0x20   : > { %697 = dma.done.wait (%p785_p1), [#allocation3], 256  }
  0x21   : > { %699 = vsyncadd (%p785_p1), [#allocation3], 4294967040  ;;  %s851_s4 = sand.u32 1, %s710_s13  }
  0x22   : > { %s492_s5 = sshll.u32 %s851_s4, 8  ;;  %s200_s7 = scalar_lea.sflag [#allocation5], %s851_s4 }
  0x23   : > { %s855_s8 = scalar_lea.vmem [#allocation4], %s492_s5 }
  0x24   : > { %701 = dma.done.wait (%p797_p5), %s200_s7, 4096  }
  0x25   : > { %703 = vsyncadd (%p797_p5), %s200_s7, 4294963200  ;;  %v861_v0 = vld [vmem:[#allocation2 + $0x8] sm:$0xff]  ;;  %v307_v1 = vld [vmem:[%s855_s8 + $0xf0] sm:$0xff]  ;;  %v734_v14 = vmov 128.0   ;;  %s493_s22 = sshll.u32 %s851_s4, 5  ;;  %s500_s10 = sshll.u32 (%p826_p0), %s718_s15, 4 }
  0x26   : > { %v233_v2 = vmul.f32 %v861_v0, %v861_v0  ;;  %501 = vmatpush.msra.mxu2 %v307_v1  ;;  %v308_v3 = vld [vmem:[%s855_s8 + $0xf8] sm:$0xff]  ;;  %v305_v4 = vld [vmem:[%s855_s8 + $0xe0] sm:$0xff]  ;;  %v306_v5 = vld [vmem:[%s855_s8 + $0xe8] sm:$0xff]  ;;  %309 = vmatpush.msra.mxu0 %v307_v1  ;;  %606 = vrcp.f32 %v734_v14  ;;  %s225_s9 = scalar_lea.vmem [#allocation6], %s493_s22  ;;  %s371_s23 = scalar_lea.vmem (%p826_p0), %s934_s3, %s500_s10 }
  0x27   : > { %517 = vmatpush.msra.mxu3 %v308_v3  ;;  %v303_v6 = vld [vmem:[%s855_s8 + $0xd0] sm:$0xff]  ;;  %332 = vmatpush.msra.mxu1 %v308_v3  ;;  %v304_v7 = vld [vmem:[%s855_s8 + $0xd8] sm:$0xff]  ;;  %v301_v10 = vld [vmem:[%s855_s8 + $0xc0] sm:$0xff] }
  0x28   : > { %236 = vadd.xlane.f32.xlu0 %v233_v2  ;;  %502 = vmatpush.msra.mxu2 %v305_v4  ;;  %v871_v8 = vld [vmem:[#allocation2] sm:$0xff]  ;;  %v302_v11 = vld [vmem:[%s855_s8 + $0xc8] sm:$0xff]  ;;  %v300_v13 = vld [vmem:[%s855_s8 + $0xb8] sm:$0xff] }
  0x29   : > { %518 = vmatpush.msra.mxu3 %v306_v5  ;;  %310 = vmatpush.msra.mxu0 %v305_v4  ;;  %v232_v9 = vmul.f32 %v871_v8, %v871_v8  ;;  %v299_v12 = vld [vmem:[%s855_s8 + $0xb0] sm:$0xff]  ;;  %v297_v15 = vld [vmem:[%s855_s8 + $0xa0] sm:$0xff]  ;;  %v298_v16 = vld [vmem:[%s855_s8 + $0xa8] sm:$0xff] }
  0x2a   : > { %503 = vmatpush.msra.mxu2 %v303_v6  ;;  %333 = vmatpush.msra.mxu1 %v306_v5  ;;  %v295_v17 = vld [vmem:[%s855_s8 + $0x90] sm:$0xff]  ;;  %v296_v18 = vld [vmem:[%s855_s8 + $0x98] sm:$0xff]  ;;  %v293_v19 = vld [vmem:[%s855_s8 + $0x80] sm:$0xff] }
  0x2b   : > { %519 = vmatpush.msra.mxu3 %v304_v7  ;;  %311 = vmatpush.msra.mxu0 %v303_v6  ;;  %v294_v20 = vld [vmem:[%s855_s8 + $0x88] sm:$0xff]  ;;  %v291_v22 = vld [vmem:[%s855_s8 + $0x70] sm:$0xff]  ;;  %v292_v23 = vld [vmem:[%s855_s8 + $0x78] sm:$0xff] }
  0x2c   : > { %334 = vmatpush.msra.mxu1 %v304_v7  ;;  %504 = vmatpush.msra.mxu2 %v301_v10  ;;  %v607_v21 = vpop.eup %606  ;;  %v289_v24 = vld [vmem:[%s855_s8 + $0x60] sm:$0xff]  ;;  %v290_v25 = vld [vmem:[%s855_s8 + $0x68] sm:$0xff]  ;;  %v287_v27 = vld [vmem:[%s855_s8 + $0x50] sm:$0xff] }
  0x2d   : > { %520 = vmatpush.msra.mxu3 %v302_v11  ;;  %312 = vmatpush.msra.mxu0 %v301_v10  ;;  %v239_v26 = vmul.f32 128.0, %v607_v21  ;;  %v288_v28 = vld [vmem:[%s855_s8 + $0x58] sm:$0xff]  ;;  %v285_v29 = vld [vmem:[%s855_s8 + $0x40] sm:$0xff]  ;;  %v286_v30 = vld [vmem:[%s855_s8 + $0x48] sm:$0xff]  ;;  %vm243_vm0 = vweird.f32 %v607_v21 }
  0x2e   : > { %335 = vmatpush.msra.mxu1 %v302_v11  ;;  %505 = vmatpush.msra.mxu2 %v299_v12  ;;  %v283_v32 = vld [vmem:[%s855_s8 + $0x30] sm:$0xff]  ;;  %v284_v33 = vld [vmem:[%s855_s8 + $0x38] sm:$0xff]  ;;  %v281_v34 = vld [vmem:[%s855_s8 + $0x20] sm:$0xff] }
  0x2f   : > { %521 = vmatpush.msra.mxu3 %v300_v13  ;;  %313 = vmatpush.msra.mxu0 %v299_v12  ;;  %v240_v31 = vsub.f32 1.0, %v239_v26  ;;  %v282_v35 = vld [vmem:[%s855_s8 + $0x28] sm:$0xff]  ;;  %v279_v37 = vld [vmem:[%s855_s8 + $0x10] sm:$0xff]  ;;  %v280_v38 = vld [vmem:[%s855_s8 + $0x18] sm:$0xff] }
  0x30   : > { %234 = vadd.xlane.f32.xlu0 %v232_v9  ;;  %336 = vmatpush.msra.mxu1 %v300_v13  ;;  %v277_v39 = vld [vmem:[%s855_s8] sm:$0xff]  ;;  %v278_v40 = vld [vmem:[%s855_s8 + $0x8] sm:$0xff]  ;;  %v605_v57 = vld [vmem:[%s932_s1] ss:$0 sm:$0xff] }
  0x31   : > { %506 = vmatpush.msra.mxu2 %v297_v15  ;;  %522 = vmatpush.msra.mxu3 %v298_v16  ;;  %v241_v36 = vmul.f32 %v607_v21, %v240_v31 }
  0x32   : > { %314 = vmatpush.msra.mxu0 %v297_v15  ;;  %337 = vmatpush.msra.mxu1 %v298_v16 }
  0x33   : > { %507 = vmatpush.msra.mxu2 %v295_v17  ;;  %523 = vmatpush.msra.mxu3 %v296_v18  ;;  %v242_v41 = vadd.f32 %v607_v21, %v241_v36 }
  0x34   : > { %315 = vmatpush.msra.mxu0 %v295_v17  ;;  %338 = vmatpush.msra.mxu1 %v296_v18 }
  0x35   : > { %508 = vmatpush.msra.mxu2 %v293_v19  ;;  %524 = vmatpush.msra.mxu3 %v294_v20  ;;  %v244_v42 = vsel %vm243_vm0, %v607_v21, %v242_v41 }
  0x36   : > { %316 = vmatpush.msra.mxu0 %v293_v19  ;;  %339 = vmatpush.msra.mxu1 %v294_v20 }
  0x37   : > { %509 = vmatpush.msra.mxu2 %v291_v22  ;;  %525 = vmatpush.msra.mxu3 %v292_v23 }
  0x38   : > { %317 = vmatpush.msra.mxu0 %v291_v22  ;;  %340 = vmatpush.msra.mxu1 %v292_v23 }
  0x39   : > { %510 = vmatpush.msra.mxu2 %v289_v24  ;;  %526 = vmatpush.msra.mxu3 %v290_v25 }
  0x3a   : > { %318 = vmatpush.msra.mxu0 %v289_v24  ;;  %341 = vmatpush.msra.mxu1 %v290_v25 }
  0x3b   : > { %511 = vmatpush.msra.mxu2 %v287_v27  ;;  %527 = vmatpush.msra.mxu3 %v288_v28 }
  0x3c   : > { %319 = vmatpush.msra.mxu0 %v287_v27  ;;  %342 = vmatpush.msra.mxu1 %v288_v28 }
  0x3d   : > { %512 = vmatpush.msra.mxu2 %v285_v29  ;;  %528 = vmatpush.msra.mxu3 %v286_v30 }
  0x3e   : > { %320 = vmatpush.msra.mxu0 %v285_v29  ;;  %343 = vmatpush.msra.mxu1 %v286_v30 }
  0x3f   : > { %513 = vmatpush.msra.mxu2 %v283_v32  ;;  %529 = vmatpush.msra.mxu3 %v284_v33 }
  0x40   : > { %321 = vmatpush.msra.mxu0 %v283_v32  ;;  %344 = vmatpush.msra.mxu1 %v284_v33 }
  0x41   : > { %514 = vmatpush.msra.mxu2 %v281_v34  ;;  %530 = vmatpush.msra.mxu3 %v282_v35 }
  0x42   : > { %322 = vmatpush.msra.mxu0 %v281_v34  ;;  %345 = vmatpush.msra.mxu1 %v282_v35 }
  0x43   : > { %515 = vmatpush.msra.mxu2 %v279_v37  ;;  %531 = vmatpush.msra.mxu3 %v280_v38 }
  0x44   : > { %323 = vmatpush.msra.mxu0 %v279_v37  ;;  %346 = vmatpush.msra.mxu1 %v280_v38 }
  0x45   : > { %516 = vmatpush.msra.mxu2 %v277_v39  ;;  %532 = vmatpush.msra.mxu3 %v278_v40 }
  0x46   : > { %324 = vmatpush.msra.mxu0 %v277_v39  ;;  %347 = vmatpush.msra.mxu1 %v278_v40 }
  0x9b   : > { %v237_v43 = vpop.xlane.xlu0 %236 }
  0x9c   : > { %v246_v44 = vmul.f32 %v244_v42, %v237_v43 }
  0x9e   : > { %v248_v45 = vadd.f32 1.1920929e-07, %v246_v44 }
  0xa0   : > { %608 = vrsqrt.f32 %v248_v45  ;;  %vm265_vm2 = vweird.f32 %v248_v45 }
  0xa3   : > { %v235_v46 = vpop.xlane.xlu0 %234 }
  0xa4   : > { %v245_v47 = vmul.f32 %v244_v42, %v235_v46 }
  0xa6   : > { %v609_v48 = vpop.eup %608  ;;  %v247_v49 = vadd.f32 1.1920929e-07, %v245_v47 }
  0xa7   : > { %v260_v50 = vmul.f32 %v609_v48, %v248_v45  ;;  %vm266_vm1 = vweird.f32 %v609_v48 }
  0xa8   : > { %610 = vrsqrt.f32 %v247_v49  ;;  %vm267_vm3 = vmor %vm265_vm2, %vm266_vm1  ;;  %vm255_vm5 = vweird.f32 %v247_v49 }
  0xa9   : > { %v261_v51 = vmul.f32 %v609_v48, %v260_v50 }
  0xab   : > { %v262_v52 = vmul.f32 0.5, %v261_v51 }
  0xad   : > { %v263_v53 = vsub.f32 1.5, %v262_v52 }
  0xae   : > { %v611_v54 = vpop.eup %610 }
  0xaf   : > { %v250_v55 = vmul.f32 %v611_v54, %v247_v49  ;;  %v264_v56 = vmul.f32 %v609_v48, %v263_v53  ;;  %vm256_vm4 = vweird.f32 %v611_v54 }
  0xb0   : > { %vm257_vm6 = vmor %vm255_vm5, %vm256_vm4 }
  0xb1   : > { %v251_v58 = vmul.f32 %v611_v54, %v250_v55  ;;  %v268_v59 = vsel %vm267_vm3, %v609_v48, %v264_v56 }
  0xb2   : > { %v270_v60 = vmul.f32 %v268_v59, %v861_v0 }
  0xb3   : > { %v252_v61 = vmul.f32 0.5, %v251_v58 }
  0xb4   : > { %v276_v62 = vmul.f32 %v605_v57, %v270_v60 }
  0xb5   : > { %v253_v63 = vsub.f32 1.5, %v252_v61 }
  0xb6   : > { %328 = vmatmul.f32.vlgmr.msra.gmra.mxu2 %v276_v62  ;;  %351 = vmatmul.f32.vlgmr.msra.gmra.mxu3 %v276_v62 }
  0xb7   : > { %v254_v1 = vmul.f32 %v611_v54, %v253_v63 }
  0xb9   : > { %v258_v2 = vsel %vm257_vm6, %v611_v54, %v254_v1 }
  0xba   : > { %v269_v3 = vmul.f32 %v258_v2, %v871_v8 }
  0xbc   : > { %v275_v4 = vmul.f32 %v605_v57, %v269_v3 }
  0xbe   : > { %325 = vmatmul.f32.vlgmr.msra.gmra.mxu0 %v275_v4  ;;  %348 = vmatmul.f32.vlgmr.msra.gmra.mxu1 %v275_v4 }
 0x139   : > { %v329_v5 = vpop.f32.mrf.mxu2  ;;  %v352_v6 = vpop.f32.mrf.mxu3  ;;  %365 = sbr.rel (!%p826_p0) target bundleno = 326 (0x146), region = 44 }
 0x13a   : > { %357 = vst [vmem:[%s225_s9 + $0x10] sm:$0xff] %v329_v5 }
 0x13b   : > { %358 = vst [vmem:[%s225_s9 + $0x18] sm:$0xff] %v352_v6  ;;  %v326_v0 = vpop.f32.mrf.mxu0  ;;  %v349_v7 = vpop.f32.mrf.mxu1 }
 0x13c   : > { %355 = vst [vmem:[%s225_s9] sm:$0xff] %v326_v0 }
 0x13d   : > { %356 = vst [vmem:[%s225_s9 + $0x8] sm:$0xff] %v349_v7 }
 0x141   : > { %v388_v10 = vld [vmem:[%s225_s9 + $0x10] sm:$0xff] }
 0x142   : > { %v390_v11 = vld [vmem:[%s225_s9 + $0x18] sm:$0xff]  ;;  %389 = vst [vmem:[%s371_s23 + $0x30] sm:$0xff] %v388_v10 }
 0x143   : > { %v384_v9 = vld [vmem:[%s225_s9] sm:$0xff]  ;;  %391 = vst [vmem:[%s371_s23 + $0x38] sm:$0xff] %v390_v11 }
 0x144   : > { %v386_v8 = vld [vmem:[%s225_s9 + $0x8] sm:$0xff]  ;;  %385 = vst [vmem:[%s371_s23] sm:$0xff] %v384_v9 }
 0x145   : > { %387 = vst [vmem:[%s371_s23 + $0x8] sm:$0xff] %v386_v8 }
 0x146 PF: > { %s17_s17 = sadd.s32 1, %s726_s17   ;;  %s941_s12 = smov %s710_s13 }
 0x147   : > { %p14_p1 = scmp.ge.s32.totalorder %s17_s17, 5   ;;  %s942_s13 = smov %s714_s14 }
 0x148   : > { %s943_s14 = smov %s835_s11  ;;  %s944_s15 = smov %s722_s16 }
 0x149   : > { %s945_s16 = smov %s947_s30  ;;  %16 = sbr.rel (!%p14_p1) target bundleno = 5 (0x5), region = 101 }
 0x14e   :  { %407 = vsyncpa [#allocation3], 1 }
 0x14f   :  { %409 = vsyncpa [#allocation3 + $0x1], 1 }
 0x150   :  { %410 = vsyncpa [#allocation5], 1 }
 0x151   :  { %412 = vsyncpa [#allocation5 + $0x1], 1 }

// kernel: attention_forward.4
= control target key start
LH: loop header
LB: loop body
LE: loop exit
PB: predicated region body
PF: predicated region fallthrough
CT: control target
= control target key end

     0   :  { %s1014_s15 = smov 0   ;;  %s1016_s16 = smov 0   ;;  %s1139_s0 = inlined_call_operand.vmem [shape: f32[8,8,64], index: 0, kind: input, shape index: {}]   ;;  %s1140_s1 = inlined_call_operand.vmem [shape: f32[8,8,64], index: 1, kind: input, shape index: {}]   ;;  %s1141_s2 = inlined_call_operand.vmem [shape: f32[8,8,64], index: 2, kind: input, shape index: {}]   ;;  %s1142_s3 = inlined_call_operand.vmem [shape: s32[2,1,8], index: 3, kind: input, shape index: {}]   ;;  %s1143_s4 = inlined_call_operand.vmem [shape: f32[8,8,64], index: 4, kind: output, shape index: {}]  }
   0x1   :  { %s1018_s17 = smov 0  }
   0x2 LB: > { %s33_s18 = sadd.s32 1, %s980_s16  ;;  %p885_p0 = scmp.ge.s32.totalorder %s984_s17, 1  ;;  %s984_s17 = sphi %s1018_s17, %s14_s17   ;;  %s980_s16 = sphi %s1016_s16, %s1147_s16   ;;  %s976_s15 = sphi %s1014_s15, %s1146_s15  }
   0x3   : > { %p35_p1 = scmp.ge.s32.totalorder %s33_s18, 2  ;;  %p241_p2 = scmp.lt.s32.totalorder %s984_s17, 3 }
   0x5   : > { %s1149_s18 = smov (%p35_p1, %s33_s18), 0  ;;  %p242_p3 = pnand %p885_p0, %p241_p2 }
   0x6   : > { %s886_s19 = sshll.u32 (!%p242_p3), %s976_s15, 2  ;;  %p323_p5 = scmp.lt.s32.totalorder (!%p242_p3), %s976_s15, 1 }
   0x7   : > { %245 = sbr.rel (%p242_p3) target bundleno = 694 (0x2b6), region = 36  ;;  %p295_p4 = scmp.lt.s32.totalorder (!%p242_p3), %s886_s19, 7 }
   0xc   : > { %s1151_s19 = smov (!%p295_p4, %s886_s19), 7  ;;  %vm350_vm0 = vcmask 523264   ;;  %v986_v8 = vmov 0   ;;  %s1153_s15 = smov (!%p323_p5, %s976_s15), 1  ;;  %vm341_vm2 = vcmask 7168   ;;  %v481_v11 = vlaneseq }
   0xd   : > { %s1035_s20 = sshll.u32 %s1151_s19, 3  ;;  %935 = vset.pattern.permute.xlu0 %v986_v8  ;;  %937 = vset.pattern.permute.xlu2 %v986_v8  ;;  %s328_s29 = scalar_lea.vmem %s1142_s3, %s1153_s15  ;;  %v987_v10 = vmov -2.3819763e+38   ;;  %vm502_vm6 = vcmask 64512   ;;  %v988_v33 = vmov 0.0  }
   0xe   : > { %s309_s23 = scalar_lea.vmem %s1140_s1, %s1035_s20  ;;  %s298_s26 = scalar_lea.vmem %s1139_s0, %s1035_s20  ;;  %936 = vset.pattern.permute.xlu1 %v986_v8  ;;  %v488_v9 = vld [vmem:[%s328_s29] sm:$0x1]  ;;  %342 = vst.msk [vmem:[#allocation2] sm:$0xff] %vm341_vm2, %v987_v10  ;;  %v482_v13 = vshrl.u32 %v481_v11, 7  ;;  %v484_v14 = vand.u32 127, %v481_v11 }
   0xf   : > { %v364_v0 = vld [vmem:[%s309_s23] sm:$0xff]  ;;  %v366_v1 = vld [vmem:[%s309_s23 + $0x10] sm:$0xff]  ;;  %v365_v4 = vld [vmem:[%s309_s23 + $0x8] sm:$0xff]  ;;  %vm489_vm1 = vcmp.gt.s32.totalorder %v488_v9, 0  ;;  %343 = vst.msk [vmem:[#allocation2 + $0x8] sm:$0xff] %vm341_vm2, %v987_v10  ;;  %s320_s6 = scalar_lea.vmem %s1141_s2, %s1035_s20  ;;  %s334_s9 = scalar_lea.vmem %s1143_s4, %s1035_s20 }
  0x10   : > { %v360_v2 = vld [vmem:[%s298_s26] sm:$0xff]  ;;  %894 = vmatpush.xpose.msk.msra.mxu0 %vm350_vm0, %v364_v0  ;;  %898 = vmatpush.xpose.msk.msra.mxu2 %vm350_vm0, %v366_v1  ;;  %v362_v3 = vld [vmem:[%s298_s26 + $0x10] sm:$0xff]  ;;  %v367_v5 = vld [vmem:[%s309_s23 + $0x18] sm:$0xff]  ;;  %v490_v12 = vsel %vm489_vm1, 1, %v986_v8  ;;  %344 = vst.msk [vmem:[#allocation2 + $0x10] sm:$0xff] %vm341_vm2, %v987_v10  ;;  %vm487_vm3 = vcmp.le.s32.totalorder %v484_v14, %v482_v13 }
  0x11   : > { %896 = vmatpush.xpose.msk.msra.mxu1 %vm350_vm0, %v365_v4  ;;  %900 = vmatpush.xpose.msk.msra.mxu3 %vm350_vm0, %v367_v5  ;;  %v361_v6 = vld [vmem:[%s298_s26 + $0x8] sm:$0xff]  ;;  %v363_v7 = vld [vmem:[%s298_s26 + $0x18] sm:$0xff]  ;;  %345 = vst.msk [vmem:[#allocation2 + $0x18] sm:$0xff] %vm341_vm2, %v987_v10  ;;  %v491_v15 = vperm.slane %v490_v12, 0  ;;  %v370_v50 = vld [vmem:[%s320_s6 + $0x10] sm:$0xff] }
  0x12   : > { %348 = vst.msk [vmem:[#allocation3 + $0x10] sm:$0xff] %vm341_vm2, %v988_v33  ;;  %v371_v51 = vld [vmem:[%s320_s6 + $0x18] sm:$0xff]  ;;  %v368_v52 = vld [vmem:[%s320_s6] sm:$0xff]  ;;  %v369_v53 = vld [vmem:[%s320_s6 + $0x8] sm:$0xff] }
  0x13   : > { %895 = vmatmul.msk.f32.vlgmr.msra.gmra.mxu0 %vm350_vm0, %v360_v2  ;;  %899 = vmatmul.msk.f32.vlgmr.msra.gmra.mxu2 %vm350_vm0, %v362_v3  ;;  %vm492_vm4 = vcmp.eq.s32.totalorder %v491_v15, 1  ;;  %346 = vst.msk [vmem:[#allocation3] sm:$0xff] %vm341_vm2, %v988_v33 }
  0x14   : > { %897 = vmatmul.msk.f32.vlgmr.msra.gmra.mxu1 %vm350_vm0, %v361_v6  ;;  %901 = vmatmul.msk.f32.vlgmr.msra.gmra.mxu3 %vm350_vm0, %v363_v7  ;;  %vm1062_vm5 = vmand %vm487_vm3, %vm492_vm4  ;;  %347 = vst.msk [vmem:[#allocation3 + $0x8] sm:$0xff] %vm341_vm2, %v988_v33 }
  0x15   : > { %349 = vst.msk [vmem:[#allocation3 + $0x18] sm:$0xff] %vm341_vm2, %v988_v33  ;;  %v1092_v34 = vld [vmem:[#allocation2] sm:$0xff]  ;;  %684 = vmatpush.msrb.mxu2 %v370_v50  ;;  %707 = vmatpush.msrb.mxu3 %v371_v51 }
  0x16   : > { %351 = vst.msk [vmem:[#allocation4] sm:$0xff] %vm350_vm0, %v988_v33  ;;  %v499_v40 = vld [vmem:[#allocation2 + $0x8] sm:$0xff]  ;;  %638 = vmatpush.msrb.mxu0 %v368_v52  ;;  %661 = vmatpush.msrb.mxu1 %v369_v53 }
  0x17   : > { %352 = vst.msk [vmem:[#allocation4 + $0x8] sm:$0xff] %vm350_vm0, %v988_v33  ;;  %v500_v38 = vld [vmem:[#allocation2 + $0x10] sm:$0xff] }
  0x18   : > { %353 = vst.msk [vmem:[#allocation4 + $0x10] sm:$0xff] %vm350_vm0, %v988_v33  ;;  %v501_v46 = vld [vmem:[#allocation2 + $0x18] sm:$0xff] }
  0x19   : > { %354 = vst.msk [vmem:[#allocation4 + $0x18] sm:$0xff] %vm350_vm0, %v988_v33  ;;  %v565_v17 = vld [vmem:[#allocation3 + $0x10] sm:$0xff] }
  0x1c   : > { %v566_v51 = vld [vmem:[#allocation3 + $0x18] sm:$0xff] }
  0x90   : > { %v396_v16 = vpop.f32.mrf.mxu0 }
  0x91   : > { %v477_v18 = vmul.f32 0.125, %v396_v16  ;;  %v422_v19 = vpop.f32.mrf.mxu1 }
  0x92   : > { %v478_v21 = vmul.f32 0.125, %v422_v19 }
  0x93   : > { %v1068_v20 = vsel %vm1062_vm5, %v477_v18, -2.3819763e+38 }
  0x94   : > { %v503_v22 = vsel %vm502_vm6, %v1068_v20, -inf  ;;  %v1074_v25 = vsel %vm1062_vm5, %v478_v21, -2.3819763e+38 }
  0x95   : > { %504 = vmax.xlane.f32.xlu1 %v503_v22  ;;  %v506_v30 = vsel %vm502_vm6, %v1074_v25, -inf }
  0x96   : > { %v448_v23 = vpop.f32.mrf.mxu2 }
  0x97   : > { %v479_v24 = vmul.f32 0.125, %v448_v23  ;;  %v474_v26 = vpop.f32.mrf.mxu3  ;;  %v563_v23 = vld [vmem:[#allocation3] sm:$0xff] }
  0x98   : > { %v480_v28 = vmul.f32 0.125, %v474_v26 }
  0x99   : > { %v496_v27 = vsel %vm1062_vm5, %v479_v24, -2.3819763e+38 }
  0x9a   : > { %v509_v29 = vsel %vm502_vm6, %v496_v27, -inf  ;;  %v497_v31 = vsel %vm1062_vm5, %v480_v28, -2.3819763e+38  ;;  %v564_v28 = vld [vmem:[#allocation3 + $0x8] sm:$0xff] }
  0x9b   : > { %510 = vmax.xlane.f32.xlu0 %v509_v29  ;;  %v512_v32 = vsel %vm502_vm6, %v497_v31, -inf  ;;  %v592_v29 = vld [vmem:[#allocation4] sm:$0xff] }
  0x9d   : > { %507 = vmax.xlane.f32.xlu1 %v506_v30 }
  0xa3   : > { %513 = vmax.xlane.f32.xlu0 %v512_v32 }
 0x108   : > { %v505_v35 = vpop.xlane.xlu1 %504 }
 0x109   : > { %v515_v36 = vmax.f32 %v1092_v34, %v505_v35 }
 0x10b   : > { %v519_v37 = vsub.f32 %v1092_v34, %v515_v36  ;;  %720 = vst.msk [vmem:[#allocation2] sm:$0xff] %vm341_vm2, %v515_v36  ;;  %533 = vperm.xlu0 %935, %v515_v36  }
 0x10d   : > { %v523_v9 = vmul.f32 1.442695, %v519_v37 }
 0x10e   : > { %v511_v39 = vpop.xlane.xlu0 %510 }
 0x10f   : > { %v517_v41 = vmax.f32 %v500_v38, %v511_v39 }
 0x110   : > { %v508_v42 = vpop.xlane.xlu1 %507 }
 0x111   : > { %v521_v43 = vsub.f32 %v500_v38, %v517_v41  ;;  %722 = vst.msk [vmem:[#allocation2 + $0x10] sm:$0xff] %vm341_vm2, %v517_v41  ;;  %v516_v44 = vmax.f32 %v499_v40, %v508_v42  ;;  %543 = vperm.xlu2 %937, %v517_v41   ;;  %v594_v38 = vld [vmem:[#allocation4 + $0x10] sm:$0xff] }
 0x113   : > { %v520_v45 = vsub.f32 %v499_v40, %v516_v44  ;;  %721 = vst.msk [vmem:[#allocation2 + $0x8] sm:$0xff] %vm341_vm2, %v516_v44  ;;  %538 = vperm.xlu1 %936, %v516_v44   ;;  %v527_v10 = vmul.f32 1.442695, %v521_v43 }
 0x115   : > { %v525_v11 = vmul.f32 1.442695, %v520_v45 }
 0x116   : > { %v514_v47 = vpop.xlane.xlu0 %513 }
 0x117   : > { %v518_v48 = vmax.f32 %v501_v46, %v514_v47 }
 0x119   : > { %v522_v49 = vsub.f32 %v501_v46, %v518_v48  ;;  %723 = vst.msk [vmem:[#allocation2 + $0x18] sm:$0xff] %vm341_vm2, %v518_v48  ;;  %548 = vperm.xlu2 %937, %v518_v48   ;;  %v593_v46 = vld [vmem:[#allocation4 + $0x8] sm:$0xff] }
 0x11b   : > { %v529_v16 = vmul.f32 1.442695, %v522_v49 }
 0x16b   : > { %v544_v54 = vpop.permute.xlu2 %543 }
 0x16c   : > { %v553_v55 = vsub.f32 %v496_v27, %v544_v54 }
 0x16e   : > { %v559_v56 = vmul.f32 1.442695, %v553_v55  ;;  %v595_v55 = vld [vmem:[#allocation4 + $0x18] sm:$0xff] }
 0x170   : > { %938 = vpow2.f32 %v559_v56 }
 0x173   : > { %v549_v57 = vpop.permute.xlu2 %548 }
 0x174   : > { %v554_v58 = vsub.f32 %v497_v31, %v549_v57 }
 0x176   : > { %v939_v59 = vpop.eup %938  ;;  %v561_v60 = vmul.f32 1.442695, %v554_v58 }
 0x177   : > { %904 = vmatmul.msk.f32.vlgmr.msrb.gmra.mxu2 %vm502_vm6, %v939_v59  ;;  %v577_v61 = vsel %vm502_vm6, %v939_v59, 0.0 }
 0x178   : > { %940 = vpow2.f32 %v561_v60  ;;  %578 = vadd.xlane.f32.xlu0 %v577_v61 }
 0x17d   : > { %v534_v62 = vpop.permute.xlu0 %533 }
 0x17e   : > { %v941_v63 = vpop.eup %940  ;;  %v551_v0 = vsub.f32 %v1068_v20, %v534_v62 }
 0x17f   : > { %905 = vmatmul.msk.f32.vlgmr.msrb.gmra.mxu3 %vm502_vm6, %v941_v63  ;;  %v580_v15 = vsel %vm502_vm6, %v941_v63, 0.0 }
 0x180   : > { %v555_v1 = vmul.f32 1.442695, %v551_v0 }
 0x182   : > { %942 = vpow2.f32 %v555_v1 }
 0x185   : > { %v539_v2 = vpop.permute.xlu1 %538 }
 0x186   : > { %v552_v3 = vsub.f32 %v1074_v25, %v539_v2 }
 0x188   : > { %v943_v4 = vpop.eup %942  ;;  %v557_v5 = vmul.f32 1.442695, %v552_v3 }
 0x189   : > { %902 = vmatmul.msk.f32.vlgmr.msrb.gmra.mxu0 %vm502_vm6, %v943_v4  ;;  %v571_v6 = vsel %vm502_vm6, %v943_v4, 0.0 }
 0x18a   : > { %944 = vpow2.f32 %v557_v5  ;;  %572 = vadd.xlane.f32.xlu2 %v571_v6 }
 0x18b   : > { %946 = vpow2.f32 %v523_v9 }
 0x18c   : > { %948 = vpow2.f32 %v527_v10 }
 0x18d   : > { %950 = vpow2.f32 %v525_v11 }
 0x18e   : > { %952 = vpow2.f32 %v529_v16 }
 0x190   : > { %v945_v7 = vpop.eup %944 }
 0x191   : > { %903 = vmatmul.msk.f32.vlgmr.msrb.gmra.mxu1 %vm502_vm6, %v945_v7  ;;  %v574_v8 = vsel %vm502_vm6, %v945_v7, 0.0  ;;  %v947_v12 = vpop.eup %946 }
 0x192   : > { %575 = vadd.xlane.f32.xlu1 %v574_v8  ;;  %v949_v13 = vpop.eup %948  ;;  %v567_v25 = vmul.f32 %v947_v12, %v563_v23 }
 0x193   : > { %v951_v14 = vpop.eup %950  ;;  %v569_v19 = vmul.f32 %v949_v13, %v565_v17 }
 0x194   : > { %v953_v18 = vpop.eup %952  ;;  %v568_v30 = vmul.f32 %v951_v14, %v564_v28 }
 0x195   : > { %v570_v52 = vmul.f32 %v953_v18, %v566_v51 }
 0x1a2   : > { %598 = vperm.xlu2 %937, %v947_v12  }
 0x1aa   : > { %608 = vperm.xlu2 %937, %v949_v13  }
 0x1ab   : > { %603 = vperm.xlu1 %936, %v951_v14  }
 0x1d3   : > { %581 = vadd.xlane.f32.xlu2 %v580_v15 }
 0x1eb   : > { %v579_v20 = vpop.xlane.xlu0 %578  ;;  %613 = vperm.xlu2 %937, %v953_v18  }
 0x1ec   : > { %v585_v21 = vadd.f32 %v579_v20, %v569_v19 }
 0x1ee   : > { %590 = vst.msk [vmem:[#allocation3 + $0x10] sm:$0xff] %vm341_vm2, %v585_v21 }
 0x1f5   : > { %v729_v22 = vld [vmem:[#allocation3 + $0x10] sm:$0xff] }
 0x1f6   : > { %954 = vrcp.f32 %v729_v22 }
 0x1fa   : > { %v686_v42 = vpop.f32.mrf.mxu2 }
 0x1fc   : > { %v955_v24 = vpop.eup %954 }
 0x1fd   : > { %v573_v26 = vpop.xlane.xlu2 %572  ;;  %751 = vperm.xlu1 %936, %v955_v24  }
 0x1fe   : > { %v583_v27 = vadd.f32 %v573_v26, %v567_v25 }
 0x200   : > { %588 = vst.msk [vmem:[#allocation3] sm:$0xff] %vm341_vm2, %v583_v27 }
 0x202   : > { %v709_v58 = vpop.f32.mrf.mxu3 }
 0x205   : > { %v599_v31 = vpop.permute.xlu2 %598  ;;  %v576_v32 = vpop.xlane.xlu1 %575 }
 0x206   : > { %v616_v33 = vmul.f32 %v599_v31, %v592_v29  ;;  %v584_v34 = vadd.f32 %v576_v32, %v568_v30  ;;  %v640_v35 = vpop.f32.mrf.mxu0 }
 0x207   : > { %v727_v36 = vld [vmem:[#allocation3] sm:$0xff] }
 0x208   : > { %589 = vst.msk [vmem:[#allocation3 + $0x8] sm:$0xff] %vm341_vm2, %v584_v34  ;;  %v712_v37 = vadd.f32 %v640_v35, %v616_v33  ;;  %956 = vrcp.f32 %v727_v36 }
 0x20a   : > { %716 = vst.msk [vmem:[#allocation4] sm:$0xff] %vm350_vm0, %v712_v37 }
 0x20d   : > { %v609_v39 = vpop.permute.xlu2 %608 }
 0x20e   : > { %v957_v40 = vpop.eup %956  ;;  %v618_v41 = vmul.f32 %v609_v39, %v594_v38  ;;  %v663_v49 = vpop.f32.mrf.mxu1 }
 0x20f   : > { %741 = vperm.xlu0 %935, %v957_v40   ;;  %v728_v43 = vld [vmem:[#allocation3 + $0x8] sm:$0xff] }
 0x210   : > { %v714_v44 = vadd.f32 %v686_v42, %v618_v41  ;;  %958 = vrcp.f32 %v728_v43 }
 0x211   : > { %v735_v0 = vld [vmem:[#allocation4] sm:$0xff] }
 0x212   : > { %718 = vst.msk [vmem:[#allocation4 + $0x10] sm:$0xff] %vm350_vm0, %v714_v44 }
 0x216   : > { %v959_v45 = vpop.eup %958 }
 0x217   : > { %746 = vperm.xlu2 %937, %v959_v45  }
 0x219   : > { %v737_v4 = vld [vmem:[#allocation4 + $0x10] sm:$0xff] }
 0x21d   : > { %v604_v47 = vpop.permute.xlu1 %603 }
 0x21e   : > { %v617_v48 = vmul.f32 %v604_v47, %v593_v46 }
 0x220   : > { %v713_v50 = vadd.f32 %v663_v49, %v617_v48 }
 0x222   : > { %717 = vst.msk [vmem:[#allocation4 + $0x8] sm:$0xff] %vm350_vm0, %v713_v50 }
 0x229   : > { %v736_v2 = vld [vmem:[#allocation4 + $0x8] sm:$0xff] }
 0x246   : > { %v582_v53 = vpop.xlane.xlu2 %581 }
 0x247   : > { %v586_v54 = vadd.f32 %v582_v53, %v570_v52 }
 0x249   : > { %591 = vst.msk [vmem:[#allocation3 + $0x18] sm:$0xff] %vm341_vm2, %v586_v54 }
 0x24e   : > { %v614_v56 = vpop.permute.xlu2 %613 }
 0x24f   : > { %v619_v57 = vmul.f32 %v614_v56, %v595_v55 }
 0x250   : > { %v730_v59 = vld [vmem:[#allocation3 + $0x18] sm:$0xff] }
 0x251   : > { %v715_v60 = vadd.f32 %v709_v58, %v619_v57  ;;  %960 = vrcp.f32 %v730_v59 }
 0x253   : > { %719 = vst.msk [vmem:[#allocation4 + $0x18] sm:$0xff] %vm350_vm0, %v715_v60 }
 0x257   : > { %v961_v61 = vpop.eup %960 }
 0x258   : > { %756 = vperm.xlu2 %937, %v961_v61  }
 0x25a   : > { %v738_v7 = vld [vmem:[#allocation4 + $0x18] sm:$0xff] }
 0x26f   : > { %v752_v63 = vpop.permute.xlu1 %751 }
 0x270   : > { %v761_v6 = vmul.f32 %v752_v63, %v737_v4 }
 0x271   : > { %v747_v62 = vpop.permute.xlu2 %746 }
 0x272   : > { %v760_v5 = vmul.f32 %v747_v62, %v736_v2  ;;  %766 = vst.msk [vmem:[%s334_s9 + $0x10] sm:$0xff] %vm350_vm0, %v761_v6 }
 0x274   : > { %765 = vst.msk [vmem:[%s334_s9 + $0x8] sm:$0xff] %vm350_vm0, %v760_v5 }
 0x281   : > { %v742_v1 = vpop.permute.xlu0 %741 }
 0x282   : > { %v759_v3 = vmul.f32 %v742_v1, %v735_v0 }
 0x284   : > { %764 = vst.msk [vmem:[%s334_s9] sm:$0xff] %vm350_vm0, %v759_v3 }
 0x2b2   : > { %v757_v8 = vpop.permute.xlu2 %756 }
 0x2b3   : > { %v762_v9 = vmul.f32 %v757_v8, %v738_v7 }
 0x2b5   : > { %767 = vst.msk [vmem:[%s334_s9 + $0x18] sm:$0xff] %vm350_vm0, %v762_v9 }
 0x2b6 PF: > { %s14_s17 = sadd.s32 1, %s984_s17   ;;  %s1146_s15 = smov %s980_s16 }
 0x2b7   : > { %p11_p6 = scmp.ge.s32.totalorder %s14_s17, 4   ;;  %s1147_s16 = smov %s1149_s18 }
 0x2b9   :  { %13 = sbr.rel (!%p11_p6) target bundleno = 2 (0x2), region = 87 }

</bundles_post_ra>
